<compile_context>
chip_gen: v7x
topology: tpu7x:2x2x1
jax: 0.10.0
libtpu: 0.0.40
codegen_flags: <defaults>
</compile_context>

<pallas_src>
import math

import jax
import jax.numpy as jnp
from jax.experimental import pallas as pl
from jax.experimental.pallas import tpu as pltpu


_SQRT_2_OVER_PI = 0.7978845608028654  # sqrt(2/pi)


def _gelu_tanh(h):
    # nn.GELU(approximate='tanh'), computed in f32.
    return 0.5 * h * (1.0 + jnp.tanh(_SQRT_2_OVER_PI * (h + 0.044715 * h * h * h)))


def _mlp_kernel(x_ref, w1_ref, b1_ref, w2_ref, b2_ref, o_ref, acc_ref):
    # x_ref : (tm, D) f32     w1_ref: (D, th) bf16    b1_ref: (1, th) f32
    # w2_ref: (th, D) bf16    b2_ref: (1, D)  f32
    # o_ref : (tm, D)         acc_ref: (tm, D) f32 scratch (c_proj accumulator)
    j = pl.program_id(1)

    @pl.when(j == 0)
    def _():
        acc_ref[...] = jnp.zeros_like(acc_ref)

    # c_fc on this H tile: bf16 MXU operands, f32 accumulation, f32 bias add.
    x = x_ref[...].astype(jnp.bfloat16)
    h = jnp.dot(x, w1_ref[...], preferred_element_type=jnp.float32) + b1_ref[...]

    # GELU (tanh approximation) in f32.
    g = _gelu_tanh(h)

    # Partial c_proj contribution of this H tile, accumulated in f32.
    acc_ref[...] += jnp.dot(g.astype(jnp.bfloat16), w2_ref[...],
                            preferred_element_type=jnp.float32)

    @pl.when(j == pl.num_programs(1) - 1)
    def _():
        o_ref[...] = (acc_ref[...] + b2_ref[...]).astype(o_ref.dtype)


def _round_up(x, m):
    return pl.cdiv(x, m) * m


def _vmem_limit_bytes(tm, th, D):
    dbl = 2  # default double-buffering of pipelined operands
    est = (
        tm * D * 4 * dbl      # x tile (f32)
        + D * th * 2 * dbl    # W_fc tile (bf16)
        + th * D * 2 * dbl    # W_proj tile (bf16)
        + tm * D * 4 * dbl    # out tile (f32)
        + tm * D * 4          # accumulator scratch (f32)
        + tm * th * 4 * 2     # h / g (tm, th) f32 temporaries
        + (th + D) * 4 * dbl  # biases
    )
    # 2x headroom, clamped to a range that is safe on v5e / v6e / v7x (64 MiB).
    return int(min(48 * 1024 * 1024, max(2 * est, 16 * 1024 * 1024)))


def mlp_forward(x, w_fc, b_fc, w_proj, b_proj, *, tm=256, th=512):
    """x: (B, T, D) float32. Weights in (in, out) layout, biases (1, out)."""
    B, T, D = x.shape
    H = w_fc.shape[1]
    M = B * T
    x2d = x.reshape(M, D)

    # Token tile: multiple of 8 sublanes, clamped to the (sublane-padded) size.
    tm = int(min(_round_up(tm, 8), _round_up(M, 8)))
    M_pad = int(_round_up(M, tm))
    if M_pad != M:
        x2d = jnp.pad(x2d, ((0, M_pad - M), (0, 0)))

    # Hidden tile: lane-aligned (multiple of 128) and a divisor of H
    # (fall back to a single H tile otherwise).
    th = int(min(_round_up(th, 128), H))
    if H % th != 0:
        th = H

    # bf16 MXU operands for the weights; accumulation stays f32 in the kernel.
    w1 = w_fc.astype(jnp.bfloat16)
    w2 = w_proj.astype(jnp.bfloat16)
    b1 = b_fc.reshape(1, H).astype(jnp.float32)
    b2 = b_proj.reshape(1, D).astype(jnp.float32)

    grid = (M_pad // tm, H // th)

    out2d = pl.pallas_call(
        _mlp_kernel,
        out_shape=jax.ShapeDtypeStruct((M_pad, D), x.dtype),
        grid_spec=pltpu.PrefetchScalarGridSpec(
            num_scalar_prefetch=0,
            grid=grid,
            in_specs=[
                pl.BlockSpec((tm, D), lambda i, j: (i, 0)),   # x token tile
                pl.BlockSpec((D, th), lambda i, j: (0, j)),   # W_fc H-tile
                pl.BlockSpec((1, th), lambda i, j: (0, j)),   # b_fc H-tile
                pl.BlockSpec((th, D), lambda i, j: (j, 0)),   # W_proj H-tile
                pl.BlockSpec((1, D), lambda i, j: (0, 0)),    # b_proj
            ],
            out_specs=pl.BlockSpec((tm, D), lambda i, j: (i, 0)),
            scratch_shapes=[pltpu.VMEM((tm, D), jnp.float32)],
        ),
        compiler_params=pltpu.CompilerParams(
            dimension_semantics=("parallel", "arbitrary"),
            vmem_limit_bytes=_vmem_limit_bytes(tm, th, D),
        ),
    )(x2d, w1, b1, w2, b2)

    return out2d[:M].reshape(B, T, D)


def _reference_mlp(x2d, w_fc, b_fc, w_proj, b_proj):
    # Mirrors the kernel's precision path: bf16 MXU operands, f32 accumulation,
    # f32 GELU.
    h = jnp.dot(x2d.astype(jnp.bfloat16), w_fc.astype(jnp.bfloat16),
                preferred_element_type=jnp.float32) + b_fc
    g = _gelu_tanh(h)
    return jnp.dot(g.astype(jnp.bfloat16), w_proj.astype(jnp.bfloat16),
                   preferred_element_type=jnp.float32) + b_proj


if __name__ == "__main__":
    # Small but lane-dense test shapes (D, H multiples of 128 keep stores
    # unmasked); the GPT module uses D = n_embed, H = 4 * n_embed.
    B, T, D = 2, 24, 128
    H = 4 * D  # 512

    key = jax.random.PRNGKey(0)
    kx, k1, k2, k3, k4 = jax.random.split(key, 5)

    # PyTorch-style uniform +-1/sqrt(fan_in) init, stored in (in, out) layout.
    bound_fc = 1.0 / math.sqrt(D)
    bound_proj = 1.0 / math.sqrt(H)
    w_fc = jax.random.uniform(k1, (D, H), jnp.float32, -bound_fc, bound_fc)
    b_fc = jax.random.uniform(k2, (1, H), jnp.float32, -bound_fc, bound_fc)
    w_proj = jax.random.uniform(k3, (H, D), jnp.float32, -bound_proj, bound_proj)
    b_proj = jax.random.uniform(k4, (1, D), jnp.float32, -bound_proj, bound_proj)

    x = jax.random.normal(kx, (B, T, D), jnp.float32)

    ref = _reference_mlp(x.reshape(B * T, D), w_fc, b_fc, w_proj, b_proj
                         ).reshape(B, T, D)

    # 1) Default tiles (this toy size collapses to a single block).
    out_default = jax.block_until_ready(
        mlp_forward(x, w_fc, b_fc, w_proj, b_proj))
    # 2) Small explicit tiles: exercises the M-tail padding (48 -> 64 rows),
    #    the multi-tile token axis, and the H-axis accumulator (grid = (2, 4)).
    out_tiled = jax.block_until_ready(
        mlp_forward(x, w_fc, b_fc, w_proj, b_proj, tm=32, th=128))

    for out in (out_default, out_tiled):
        assert out.shape == (B, T, D)
        assert jnp.allclose(out, ref, atol=2e-3, rtol=2e-3), "mismatch vs reference"

    print("KERNEL_OK")
</pallas_src>

<mosaic_0001>
module attributes {stable_mosaic.version = 11 : i64} {
  func.func @_mlp_kernel(%arg0: i32, %arg1: i32, %arg2: memref<48x128xf32, #tpu.memory_space<vmem>>, %arg3: memref<128x512xbf16, #tpu.memory_space<vmem>>, %arg4: memref<1x512xf32, #tpu.memory_space<vmem>>, %arg5: memref<512x128xbf16, #tpu.memory_space<vmem>>, %arg6: memref<1x128xf32, #tpu.memory_space<vmem>>, %arg7: memref<48x128xf32, #tpu.memory_space<vmem>>, %arg8: memref<48x128xf32, #tpu.memory_space<vmem>>) attributes {dimension_semantics = [#tpu.dimension_semantics<parallel>, #tpu.dimension_semantics<arbitrary>], iteration_bounds = array<i64: 1, 1>, scalar_prefetch = 0 : i64, scratch_operands = 1 : i64, tpu.core_type = #tpu.core_type<tc>, window_params = [{transform_indices = @transform_0, window_bounds = array<i64: 48, 128>}, {transform_indices = @transform_1, window_bounds = array<i64: 128, 512>}, {transform_indices = @transform_2, window_bounds = array<i64: 1, 512>}, {transform_indices = @transform_3, window_bounds = array<i64: 512, 128>}, {pipeline_mode = #tpu.pipeline_mode<synchronous>, transform_indices = @transform_4, window_bounds = array<i64: 1, 128>}, {transform_indices = @transform_5, window_bounds = array<i64: 48, 128>}]} {
    %c0_i32 = arith.constant 0 : i32
    %0 = arith.cmpi eq, %arg1, %c0_i32 : i32
    %1 = arith.extui %0 : i1 to i32
    %c0_i32_0 = arith.constant 0 : i32
    %2 = arith.cmpi ne, %1, %c0_i32_0 : i32
    scf.if %2 {
      %cst_19 = arith.constant 0.000000e+00 : f32
      %32 = vector.broadcast %cst_19 : f32 to vector<48x128xf32>
      %c0_20 = arith.constant 0 : index
      %c0_21 = arith.constant 0 : index
      %33 = vector.load %arg8[%c0_20, %c0_21] : memref<48x128xf32, #tpu.memory_space<vmem>>, vector<48x128xf32>
      tpu.vector_store %arg8[%c0_20, %c0_21], %32 {strides = array<i32>} : memref<48x128xf32, #tpu.memory_space<vmem>>, vector<48x128xf32>,
    } else {
    }
    %c0 = arith.constant 0 : index
    %c0_1 = arith.constant 0 : index
    %3 = vector.load %arg2[%c0, %c0_1] : memref<48x128xf32, #tpu.memory_space<vmem>>, vector<48x128xf32>
    %4 = arith.truncf %3 : vector<48x128xf32> to vector<48x128xbf16>
    %c0_2 = arith.constant 0 : index
    %c0_3 = arith.constant 0 : index
    %5 = vector.load %arg3[%c0_2, %c0_3] : memref<128x512xbf16, #tpu.memory_space<vmem>>, vector<128x512xbf16>
    %cst = arith.constant dense<0.000000e+00> : vector<48x512xf32>
    %6 = tpu.matmul %4, %5, %cst {dimension_numbers = #tpu.dot_dimension_numbers<[1], [0], [0], [1], [0, 0, 1, 1], [], []>} : vector<48x128xbf16>, vector<128x512xbf16>, vector<48x512xf32> -> vector<48x512xf32>
    %c0_4 = arith.constant 0 : index
    %c0_5 = arith.constant 0 : index
    %7 = vector.load %arg4[%c0_4, %c0_5] : memref<1x512xf32, #tpu.memory_space<vmem>>, vector<1x512xf32>
    %8 = vector.broadcast %7 : vector<1x512xf32> to vector<48x512xf32>
    %9 = arith.addf %6, %8 : vector<48x512xf32>
    %cst_6 = arith.constant 5.000000e-01 : f32
    %10 = vector.broadcast %cst_6 : f32 to vector<48x512xf32>
    %11 = arith.mulf %10, %9 : vector<48x512xf32>
    %cst_7 = arith.constant 4.471500e-02 : f32
    %12 = vector.broadcast %cst_7 : f32 to vector<48x512xf32>
    %13 = arith.mulf %12, %9 : vector<48x512xf32>
    %14 = arith.mulf %13, %9 : vector<48x512xf32>
    %15 = arith.mulf %14, %9 : vector<48x512xf32>
    %16 = arith.addf %9, %15 : vector<48x512xf32>
    %cst_8 = arith.constant 0.797884583 : f32
    %17 = vector.broadcast %cst_8 : f32 to vector<48x512xf32>
    %18 = arith.mulf %17, %16 : vector<48x512xf32>
    %19 = math.tanh %18 : vector<48x512xf32>
    %cst_9 = arith.constant 1.000000e+00 : f32
    %20 = vector.broadcast %cst_9 : f32 to vector<48x512xf32>
    %21 = arith.addf %20, %19 : vector<48x512xf32>
    %22 = arith.mulf %11, %21 : vector<48x512xf32>
    %c0_10 = arith.constant 0 : index
    %c0_11 = arith.constant 0 : index
    %23 = vector.load %arg8[%c0_10, %c0_11] : memref<48x128xf32, #tpu.memory_space<vmem>>, vector<48x128xf32>
    %24 = arith.truncf %22 : vector<48x512xf32> to vector<48x512xbf16>
    %c0_12 = arith.constant 0 : index
    %c0_13 = arith.constant 0 : index
    %25 = vector.load %arg5[%c0_12, %c0_13] : memref<512x128xbf16, #tpu.memory_space<vmem>>, vector<512x128xbf16>
    %cst_14 = arith.constant dense<0.000000e+00> : vector<48x128xf32>
    %26 = tpu.matmul %24, %25, %cst_14 {dimension_numbers = #tpu.dot_dimension_numbers<[1], [0], [0], [1], [0, 0, 1, 1], [], []>} : vector<48x512xbf16>, vector<512x128xbf16>, vector<48x128xf32> -> vector<48x128xf32>
    %27 = arith.addf %23, %26 : vector<48x128xf32>
    %c0_15 = arith.constant 0 : index
    %c0_16 = arith.constant 0 : index
    %28 = vector.load %arg8[%c0_15, %c0_16] : memref<48x128xf32, #tpu.memory_space<vmem>>, vector<48x128xf32>
    tpu.vector_store %arg8[%c0_15, %c0_16], %27 {strides = array<i32>} : memref<48x128xf32, #tpu.memory_space<vmem>>, vector<48x128xf32>,
    %c0_i32_17 = arith.constant 0 : i32
    %29 = arith.cmpi eq, %arg1, %c0_i32_17 : i32
    %30 = arith.extui %29 : i1 to i32
    %c0_i32_18 = arith.constant 0 : i32
    %31 = arith.cmpi ne, %30, %c0_i32_18 : i32
    scf.if %31 {
      %c0_19 = arith.constant 0 : index
      %c0_20 = arith.constant 0 : index
      %32 = vector.load %arg8[%c0_19, %c0_20] : memref<48x128xf32, #tpu.memory_space<vmem>>, vector<48x128xf32>
      %c0_21 = arith.constant 0 : index
      %c0_22 = arith.constant 0 : index
      %33 = vector.load %arg6[%c0_21, %c0_22] : memref<1x128xf32, #tpu.memory_space<vmem>>, vector<1x128xf32>
      %34 = vector.broadcast %33 : vector<1x128xf32> to vector<48x128xf32>
      %35 = arith.addf %32, %34 : vector<48x128xf32>
      %c0_23 = arith.constant 0 : index
      %c0_24 = arith.constant 0 : index
      %36 = vector.load %arg7[%c0_23, %c0_24] : memref<48x128xf32, #tpu.memory_space<vmem>>, vector<48x128xf32>
      tpu.vector_store %arg7[%c0_23, %c0_24], %35 {strides = array<i32>} : memref<48x128xf32, #tpu.memory_space<vmem>>, vector<48x128xf32>,
    } else {
    }
    return
  }
  func.func @transform_0(%arg0: i32, %arg1: i32) -> (i32, i32) {
    %c0_i32 = arith.constant 0 : i32
    %c0_i32_0 = arith.constant 0 : i32
    return %arg0, %c0_i32 : i32, i32
  }
  func.func @transform_1(%arg0: i32, %arg1: i32) -> (i32, i32) {
    %c0_i32 = arith.constant 0 : i32
    %c0_i32_0 = arith.constant 0 : i32
    return %c0_i32, %arg1 : i32, i32
  }
  func.func @transform_2(%arg0: i32, %arg1: i32) -> (i32, i32) {
    %c0_i32 = arith.constant 0 : i32
    %c0_i32_0 = arith.constant 0 : i32
    return %c0_i32, %arg1 : i32, i32
  }
  func.func @transform_3(%arg0: i32, %arg1: i32) -> (i32, i32) {
    %c0_i32 = arith.constant 0 : i32
    %c0_i32_0 = arith.constant 0 : i32
    return %arg1, %c0_i32 : i32, i32
  }
  func.func @transform_4(%arg0: i32, %arg1: i32) -> (i32, i32) {
    %c0_i32 = arith.constant 0 : i32
    %c0_i32_0 = arith.constant 0 : i32
    %c0_i32_1 = arith.constant 0 : i32
    return %c0_i32, %c0_i32_0 : i32, i32
  }
  func.func @transform_5(%arg0: i32, %arg1: i32) -> (i32, i32) {
    %c0_i32 = arith.constant 0 : i32
    %c0_i32_0 = arith.constant 0 : i32
    return %arg0, %c0_i32 : i32, i32
  }
}

</mosaic_0001>

<bundles_post_ra>
// kernel: tpu_custom_call.1
= control target key start
LH: loop header
LB: loop body
LE: loop exit
PB: predicated region body
PF: predicated region fallthrough
CT: control target
= control target key end

     0   :  { %10 = vsyncpa [#allocation4], 0  ;;  %s1795_s0 = inlined_call_operand.hbm [shape: f32[48,128], index: 0, kind: input, shape index: {}]   ;;  %s1796_s1 = inlined_call_operand.hbm [shape: bf16[128,512], index: 1, kind: input, shape index: {}]   ;;  %s1797_s2 = inlined_call_operand.vmem [shape: f32[1,512], index: 2, kind: input, shape index: {}]   ;;  %s1798_s3 = inlined_call_operand.hbm [shape: bf16[512,128], index: 3, kind: input, shape index: {}]   ;;  %s1799_s4 = inlined_call_operand.vmem [shape: f32[1,128], index: 4, kind: input, shape index: {}]   ;;  %s1800_s5 = inlined_call_operand.hbm [shape: f32[48,128], index: 5, kind: output, shape index: {}]  }
   0x1   :  { %11 = vsyncpa [#allocation7], 0 }
   0x2   :  { %12 = vsyncpa [#allocation5], 0  ;;  %s1450_s18 = smov [#allocation6]   ;;  %s1356_s22 = scalar_lea.hbm %s1796_s1, 4096 }
   0x3   :  { %s30_s19 = sshll.u32 %s1450_s18, 4  ;;  %p1357_p0 = scmp.ne.s32.totalorder %s1796_s1, %s1356_s22  ;;  %s31_s19 = int_to_ptr.vmem [resolvable:$true] %s30_s19 }
   0x4   :  { %p1360_p1 = scmp.lt.u32.totalorder %s1356_s22, %s1796_s1 }
   0x6   :  { %p1362_p2 = pnand %p1360_p1, %p1357_p0 }
   0x8   :  { %1365 = shalt.err (!%p1362_p2)
}
   0x9   :  { %s1366_s27 = scalar_lea.vmem %s31_s19, 4096  ;;  %p1371_p4 = scmp.lt.s32.totalorder %s31_s19, %s31_s19 }
   0xa   :  { %p1367_p3 = scmp.ne.s32.totalorder %s31_s19, %s1366_s27  ;;  %p1372_p5 = scmp.lt.s32.totalorder %s1366_s27, %s1366_s27 }
   0xc   :  { %p1373_p6 = por %p1372_p5, %p1371_p4 }
   0xe   :  { %p1374_p7 = pnand %p1373_p6, %p1367_p3 }
  0x10   :  { %1377 = shalt.err (!%p1374_p7)
}
  0x11   :  { %s1451_s28 = smov 256   ;;  %s1452_s29 = smov 16  }
  0x12   :  { %36 = dma.hbm_to_vmem [thread:$0]  %s1796_s1, 4096, %s31_s19, [#allocation7], %s1451_s28, %s1451_s28, %s1452_s29  }
  0x13   :  { %s1453_s7 = smov [#allocation3]   ;;  %s1378_s11 = scalar_lea.hbm %s1795_s0, 768 }
  0x14   :  { %s18_s8 = sshll.u32 %s1453_s7, 4  ;;  %p1379_p8 = scmp.ne.s32.totalorder %s1795_s0, %s1378_s11  ;;  %s19_s8 = int_to_ptr.vmem [resolvable:$true] %s18_s8 }
  0x15   :  { %p1382_p9 = scmp.lt.u32.totalorder %s1378_s11, %s1795_s0 }
  0x17   :  { %p1384_p10 = pnand %p1382_p9, %p1379_p8 }
  0x19   :  { %1387 = shalt.err (!%p1384_p10)
}
  0x1a   :  { %s1388_s16 = scalar_lea.vmem %s19_s8, 768  ;;  %p1393_p12 = scmp.lt.s32.totalorder %s19_s8, %s19_s8 }
  0x1b   :  { %p1389_p11 = scmp.ne.s32.totalorder %s19_s8, %s1388_s16  ;;  %p1394_p13 = scmp.lt.s32.totalorder %s1388_s16, %s1388_s16 }
  0x1d   :  { %p1395_p0 = por %p1394_p13, %p1393_p12 }
  0x1f   :  { %p1396_p1 = pnand %p1395_p0, %p1389_p11 }
  0x21   :  { %1399 = shalt.err (!%p1396_p1)
}
  0x22   :  { %s1454_s1 = smov 128   ;;  %s1455_s17 = smov 8  }
  0x23   :  { %24 = dma.hbm_to_vmem [thread:$0]  %s1795_s0, 768, %s19_s8, [#allocation4], %s1454_s1, %s1454_s1, %s1455_s17  }
  0x24   :  { %s1456_s20 = smov [#allocation8]   ;;  %s1400_s24 = scalar_lea.hbm %s1798_s3, 4096 }
  0x25   :  { %s44_s21 = sshll.u32 %s1456_s20, 4  ;;  %p1401_p2 = scmp.ne.s32.totalorder %s1798_s3, %s1400_s24  ;;  %s45_s21 = int_to_ptr.vmem [resolvable:$true] %s44_s21 }
  0x26   :  { %p1404_p3 = scmp.lt.u32.totalorder %s1400_s24, %s1798_s3 }
  0x28   :  { %p1406_p4 = pnand %p1404_p3, %p1401_p2 }
  0x2a   :  { %1409 = shalt.err (!%p1406_p4)
}
  0x2b   :  { %s1410_s29 = scalar_lea.vmem %s45_s21, 4096  ;;  %p1415_p6 = scmp.lt.s32.totalorder %s45_s21, %s45_s21 }
  0x2c   :  { %p1411_p5 = scmp.ne.s32.totalorder %s45_s21, %s1410_s29  ;;  %p1416_p7 = scmp.lt.s32.totalorder %s1410_s29, %s1410_s29 }
  0x2e   :  { %p1417_p8 = por %p1416_p7, %p1415_p6 }
  0x30   :  { %p1418_p9 = pnand %p1417_p8, %p1411_p5 }
  0x32   :  { %1421 = shalt.err (!%p1418_p9)
}
  0x33   :  { %s1457_s0 = smov 64   ;;  %s1458_s30 = smov 4  }
  0x34   :  { %50 = dma.hbm_to_vmem [thread:$0]  %s1798_s3, 4096, %s45_s21, [#allocation7], %s1457_s0, %s1457_s0, %s1458_s30  }
  0x35   :  { %1444 = dma.done.wait [#allocation4], 768  }
  0x36   :  { %1445 = vsyncadd [#allocation4], 4294966528 }
  0x37   :  { %1446 = dma.done.wait [#allocation7], 8192  }
  0x38   :  { %1447 = vsyncadd [#allocation7], 4294959104  ;;  %v1459_v0 = vmov 0   ;;  %v1228_v1 = vld [vmem:[#allocation6 + $0x4] ss:$16 sps:$4 sm:$0xff]   ;;  %v74_v34 = vld [vmem:[#allocation3 + $0x8] sm:$0xff] }
  0x39   :  { %328 = vmatprep.mubr.bf16.mxu0 %v1459_v0  ;;  %391 = vmatprep.mubr.bf16.mxu1 %v1459_v0  ;;  %v1230_v2 = vld [vmem:[#allocation6 + $0xc] ss:$16 sps:$4 sm:$0xff]   ;;  %v1232_v3 = vld [vmem:[#allocation6] ss:$16 sps:$4 sm:$0xff]   ;;  %v1233_v4 = vld [vmem:[#allocation6 + $0x8] ss:$16 sps:$4 sm:$0xff]  }
  0x3a   :  { %296 = vmatprep.subr.bf16.mxu0 %v1228_v1  ;;  %359 = vmatprep.subr.bf16.mxu1 %v1230_v2  ;;  %v1234_v5 = vld [vmem:[#allocation6 + $0x24] ss:$16 sps:$4 sm:$0xff]   ;;  %v1236_v6 = vld [vmem:[#allocation6 + $0x2c] ss:$16 sps:$4 sm:$0xff]   ;;  %v1238_v7 = vld [vmem:[#allocation6 + $0x20] ss:$16 sps:$4 sm:$0xff]  }
  0x3b   :  { %297 = vmatpush1.bf16.msra.mxu0 %v1232_v3  ;;  %360 = vmatpush1.bf16.msra.mxu1 %v1233_v4  ;;  %v1239_v8 = vld [vmem:[#allocation6 + $0x28] ss:$16 sps:$4 sm:$0xff]   ;;  %v1240_v9 = vld [vmem:[#allocation6 + $0x44] ss:$16 sps:$4 sm:$0xff]   ;;  %v1242_v10 = vld [vmem:[#allocation6 + $0x4c] ss:$16 sps:$4 sm:$0xff]  }
  0x3c   :  { %298 = vmatprep.subr.bf16.mxu0 %v1234_v5  ;;  %361 = vmatprep.subr.bf16.mxu1 %v1236_v6  ;;  %v1244_v11 = vld [vmem:[#allocation6 + $0x40] ss:$16 sps:$4 sm:$0xff]   ;;  %v1245_v12 = vld [vmem:[#allocation6 + $0x48] ss:$16 sps:$4 sm:$0xff]   ;;  %v1246_v13 = vld [vmem:[#allocation6 + $0x64] ss:$16 sps:$4 sm:$0xff]  }
  0x3d   :  { %v1248_v14 = vld [vmem:[#allocation6 + $0x6c] ss:$16 sps:$4 sm:$0xff]   ;;  %v1250_v15 = vld [vmem:[#allocation6 + $0x60] ss:$16 sps:$4 sm:$0xff]   ;;  %v1251_v16 = vld [vmem:[#allocation6 + $0x68] ss:$16 sps:$4 sm:$0xff]  }
  0x3e   :  { %v1252_v17 = vld [vmem:[#allocation6 + $0x84] ss:$16 sps:$4 sm:$0xff]   ;;  %v1254_v18 = vld [vmem:[#allocation6 + $0x8c] ss:$16 sps:$4 sm:$0xff]   ;;  %v1256_v19 = vld [vmem:[#allocation6 + $0x80] ss:$16 sps:$4 sm:$0xff]  }
  0x3f   :  { %299 = vmatpush1.bf16.msra.mxu0 %v1238_v7  ;;  %362 = vmatpush1.bf16.msra.mxu1 %v1239_v8  ;;  %v1257_v20 = vld [vmem:[#allocation6 + $0x88] ss:$16 sps:$4 sm:$0xff]   ;;  %v1258_v21 = vld [vmem:[#allocation6 + $0xa4] ss:$16 sps:$4 sm:$0xff]   ;;  %v1260_v22 = vld [vmem:[#allocation6 + $0xac] ss:$16 sps:$4 sm:$0xff]  }
  0x40   :  { %300 = vmatprep.subr.bf16.mxu0 %v1240_v9  ;;  %363 = vmatprep.subr.bf16.mxu1 %v1242_v10  ;;  %v1262_v23 = vld [vmem:[#allocation6 + $0xa0] ss:$16 sps:$4 sm:$0xff]   ;;  %v1263_v24 = vld [vmem:[#allocation6 + $0xa8] ss:$16 sps:$4 sm:$0xff]   ;;  %v1264_v25 = vld [vmem:[#allocation6 + $0xc4] ss:$16 sps:$4 sm:$0xff]   ;;  %v116_v10 = vlaneseq }
  0x41   :  { %v1266_v26 = vld [vmem:[#allocation6 + $0xcc] ss:$16 sps:$4 sm:$0xff]   ;;  %v1268_v27 = vld [vmem:[#allocation6 + $0xc0] ss:$16 sps:$4 sm:$0xff]   ;;  %v1269_v28 = vld [vmem:[#allocation6 + $0xc8] ss:$16 sps:$4 sm:$0xff]  }
  0x42   :  { %v1270_v29 = vld [vmem:[#allocation6 + $0xe4] ss:$16 sps:$4 sm:$0xff]   ;;  %v1272_v30 = vld [vmem:[#allocation6 + $0xec] ss:$16 sps:$4 sm:$0xff]   ;;  %v1274_v31 = vld [vmem:[#allocation6 + $0xe0] ss:$16 sps:$4 sm:$0xff]  }
  0x43   :  { %301 = vmatpush1.bf16.msra.mxu0 %v1244_v11  ;;  %364 = vmatpush1.bf16.msra.mxu1 %v1245_v12  ;;  %v1275_v32 = vld [vmem:[#allocation6 + $0xe8] ss:$16 sps:$4 sm:$0xff]   ;;  %v73_v33 = vld [vmem:[#allocation3] sm:$0xff]  ;;  %v75_v36 = vld [vmem:[#allocation3 + $0x10] sm:$0xff]  ;;  %v117_v11 = vshrl.u32 %v116_v10, 7 }
  0x44   :  { %302 = vmatprep.subr.bf16.mxu0 %v1246_v13  ;;  %365 = vmatprep.subr.bf16.mxu1 %v1248_v14  ;;  %v79_v35 = vpack.c.bf16 %v74_v34, %v73_v33  ;;  %v76_v37 = vld [vmem:[#allocation3 + $0x18] sm:$0xff]  ;;  %v77_v39 = vld [vmem:[#allocation3 + $0x20] sm:$0xff]  ;;  %v78_v40 = vld [vmem:[#allocation3 + $0x28] sm:$0xff] }
  0x45   :  { %v80_v38 = vpack.c.bf16 %v76_v37, %v75_v36  ;;  %v81_v41 = vpack.c.bf16 %v78_v40, %v77_v39  ;;  %v1276_v42 = vld [vmem:[#allocation8 + $0x40] sm:$0xff]   ;;  %v1280_v46 = vld [vmem:[#allocation8 + $0x48] sm:$0xff]   ;;  %v1284_v50 = vld [vmem:[#allocation8 + $0x50] sm:$0xff]   ;;  %v118_v12 = vsub.s32 0, %v117_v11  ;;  %v126_v13 = vsub.s32 2, %v117_v11 }
  0x46   :  { %v1277_v43 = vld [vmem:[#allocation8 + $0xc0] sm:$0xff]   ;;  %v1281_v47 = vld [vmem:[#allocation8 + $0xc8] sm:$0xff]   ;;  %v1285_v51 = vld [vmem:[#allocation8 + $0xd0] sm:$0xff]  }
  0x47   :  { %303 = vmatpush1.bf16.msra.mxu0 %v1250_v15  ;;  %366 = vmatpush1.bf16.msra.mxu1 %v1251_v16  ;;  %v1278_v44 = vld [vmem:[#allocation8] sm:$0xff]   ;;  %v1282_v48 = vld [vmem:[#allocation8 + $0x8] sm:$0xff]   ;;  %v1286_v52 = vld [vmem:[#allocation8 + $0x10] sm:$0xff]   ;;  %v122_v15 = vsub.s32 1, %v117_v11  ;;  %v130_v16 = vsub.s32 3, %v117_v11 }
  0x48   :  { %304 = vmatprep.subr.bf16.mxu0 %v1252_v17  ;;  %367 = vmatprep.subr.bf16.mxu1 %v1254_v18  ;;  %v1279_v45 = vld [vmem:[#allocation8 + $0x80] sm:$0xff]   ;;  %v1283_v49 = vld [vmem:[#allocation8 + $0x88] sm:$0xff]   ;;  %v1287_v53 = vld [vmem:[#allocation8 + $0x90] sm:$0xff]  }
  0x49   :  { %v1288_v54 = vld [vmem:[#allocation8 + $0x58] sm:$0xff]   ;;  %v1292_v58 = vld [vmem:[#allocation8 + $0x60] sm:$0xff]   ;;  %v1296_v62 = vld [vmem:[#allocation8 + $0x68] sm:$0xff]  }
  0x4a   :  { %v1289_v55 = vld [vmem:[#allocation8 + $0xd8] sm:$0xff]   ;;  %v1293_v59 = vld [vmem:[#allocation8 + $0xe0] sm:$0xff]   ;;  %v1297_v63 = vld [vmem:[#allocation8 + $0xe8] sm:$0xff]  }
  0x4b   :  { %305 = vmatpush1.bf16.msra.mxu0 %v1256_v19  ;;  %368 = vmatpush1.bf16.msra.mxu1 %v1257_v20  ;;  %v1290_v56 = vld [vmem:[#allocation8 + $0x18] sm:$0xff]   ;;  %v1294_v60 = vld [vmem:[#allocation8 + $0x20] sm:$0xff]   ;;  %v1299_v1 = vld [vmem:[#allocation8 + $0xa8] sm:$0xff]  }
  0x4c   :  { %306 = vmatprep.subr.bf16.mxu0 %v1258_v21  ;;  %369 = vmatprep.subr.bf16.mxu1 %v1260_v22  ;;  %v1291_v57 = vld [vmem:[#allocation8 + $0x98] sm:$0xff]   ;;  %v1295_v61 = vld [vmem:[#allocation8 + $0xa0] sm:$0xff]   ;;  %v1300_v2 = vld [vmem:[#allocation8 + $0x70] sm:$0xff]  }
  0x4d   :  { %v1301_v3 = vld [vmem:[#allocation8 + $0xf0] sm:$0xff]   ;;  %v1304_v6 = vld [vmem:[#allocation8 + $0x78] sm:$0xff]  }
  0x4e   :  { %v1302_v4 = vld [vmem:[#allocation8 + $0x30] sm:$0xff]   ;;  %v1305_v7 = vld [vmem:[#allocation8 + $0xf8] sm:$0xff]  }
  0x4f   :  { %307 = vmatpush1.bf16.msra.mxu0 %v1262_v23  ;;  %370 = vmatpush1.bf16.msra.mxu1 %v1263_v24  ;;  %v1303_v5 = vld [vmem:[#allocation8 + $0xb0] sm:$0xff]   ;;  %v1306_v8 = vld [vmem:[#allocation8 + $0x38] sm:$0xff]  }
  0x50   :  { %308 = vmatprep.subr.bf16.mxu0 %v1264_v25  ;;  %371 = vmatprep.subr.bf16.mxu1 %v1266_v26  ;;  %v1307_v9 = vld [vmem:[#allocation8 + $0xb8] sm:$0xff]   ;;  %v114_v14 = vld [vmem:[%s1797_s2] sm:$0xf] }
  0x51   :  { %v1539_v17 = vrot.slane %v114_v14, %v118_v12  ;;  %v1541_v18 = vrot.slane %v114_v14, %v126_v13  ;;  %v1543_v19 = vrot.slane %v114_v14, %v122_v15  ;;  %v1545_v20 = vrot.slane %v114_v14, %v130_v16 }
  0x53   :  { %309 = vmatpush1.bf16.msra.mxu0 %v1268_v27  ;;  %372 = vmatpush1.bf16.msra.mxu1 %v1269_v28 }
  0x54   :  { %310 = vmatprep.subr.bf16.mxu0 %v1270_v29  ;;  %373 = vmatprep.subr.bf16.mxu1 %v1272_v30 }
  0x57   :  { %311 = vmatpush1.bf16.msra.mxu0 %v1274_v31  ;;  %374 = vmatpush1.bf16.msra.mxu1 %v1275_v32 }
  0x58   :  { %1149 = vmatprep.subr.bf16.mxu0 %v1276_v42  ;;  %1183 = vmatprep.subr.bf16.mxu1 %v1277_v43 }
  0x5a   :  { %329 = vmatmul.mubr.bf16.vlgmr.msra.gmra.mrb[0].mxu0 %v79_v35  ;;  %392 = vmatmul.mubr.bf16.vlgmr.msra.gmra.mrb[0].mxu1 %v79_v35 }
  0x5b   :  { %338 = vmatprep.mubr.bf16.mxu0 %v1459_v0  ;;  %401 = vmatprep.mubr.bf16.mxu1 %v1459_v0 }
  0x5c   :  { %1150 = vmatpush3.bf16.msra.mxu0 %v1278_v44  ;;  %1184 = vmatpush3.bf16.msra.mxu1 %v1279_v45 }
  0x5d   :  { %1151 = vmatprep.subr.bf16.mxu0 %v1280_v46  ;;  %1185 = vmatprep.subr.bf16.mxu1 %v1281_v47 }
  0x60   :  { %1152 = vmatpush3.bf16.msra.mxu0 %v1282_v48  ;;  %1186 = vmatpush3.bf16.msra.mxu1 %v1283_v49 }
  0x61   :  { %1153 = vmatprep.subr.bf16.mxu0 %v1284_v50  ;;  %1187 = vmatprep.subr.bf16.mxu1 %v1285_v51 }
  0x62   :  { %339 = vmatmul.mubr.bf16.gmra.mrb[4].mxu0 %v80_v38  ;;  %402 = vmatmul.mubr.bf16.gmra.mrb[4].mxu1 %v80_v38 }
  0x63   :  { %348 = vmatprep.mubr.bf16.mxu0 %v1459_v0  ;;  %411 = vmatprep.mubr.bf16.mxu1 %v1459_v0  ;;  %v1298_v0 = vld [vmem:[#allocation8 + $0x28] sm:$0xff]  }
  0x64   :  { %1154 = vmatpush3.bf16.msra.mxu0 %v1286_v52  ;;  %1188 = vmatpush3.bf16.msra.mxu1 %v1287_v53 }
  0x65   :  { %1155 = vmatprep.subr.bf16.mxu0 %v1288_v54  ;;  %1189 = vmatprep.subr.bf16.mxu1 %v1289_v55 }
  0x68   :  { %1156 = vmatpush3.bf16.msra.mxu0 %v1290_v56  ;;  %1190 = vmatpush3.bf16.msra.mxu1 %v1291_v57 }
  0x69   :  { %1157 = vmatprep.subr.bf16.mxu0 %v1292_v58  ;;  %1191 = vmatprep.subr.bf16.mxu1 %v1293_v59 }
  0x6a   :  { %349 = vmatmul.mubr.bf16.gmra.mrb[8].mxu0 %v81_v41  ;;  %412 = vmatmul.mubr.bf16.gmra.mrb[8].mxu1 %v81_v41 }
  0x6c   :  { %1158 = vmatpush3.bf16.msra.mxu0 %v1294_v60  ;;  %1192 = vmatpush3.bf16.msra.mxu1 %v1295_v61 }
  0x6d   :  { %1159 = vmatprep.subr.bf16.mxu0 %v1296_v62  ;;  %1193 = vmatprep.subr.bf16.mxu1 %v1297_v63 }
  0x70   :  { %1160 = vmatpush3.bf16.msra.mxu0 %v1298_v0  ;;  %1194 = vmatpush3.bf16.msra.mxu1 %v1299_v1 }
  0x71   :  { %1161 = vmatprep.subr.bf16.mxu0 %v1300_v2  ;;  %1195 = vmatprep.subr.bf16.mxu1 %v1301_v3 }
  0x74   :  { %1162 = vmatpush3.bf16.msra.mxu0 %v1302_v4  ;;  %1196 = vmatpush3.bf16.msra.mxu1 %v1303_v5 }
  0x75   :  { %1163 = vmatprep.subr.bf16.mxu0 %v1304_v6  ;;  %1197 = vmatprep.subr.bf16.mxu1 %v1305_v7 }
  0x78   :  { %1164 = vmatpush3.bf16.msra.mxu0 %v1306_v8  ;;  %1198 = vmatpush3.bf16.msra.mxu1 %v1307_v9 }
 0x12d   :  { %v330_v21 = vpop.f32.mrb[0].mxu0  ;;  %v393_v22 = vpop.f32.mrb[0].mxu1 }
 0x12e   :  { %v331_v23 = vadd.f32 %v330_v21, %v1539_v17  ;;  %v394_v24 = vadd.f32 %v393_v22, %v1541_v18  ;;  %v332_v25 = vpop.f32.mrb[1].mxu0  ;;  %v395_v26 = vpop.f32.mrb[1].mxu1 }
 0x12f   :  { %v1550_v27 = vadd.f32 %v332_v25, %v1543_v19  ;;  %v1553_v28 = vadd.f32 %v395_v26, %v1545_v20  ;;  %v334_v29 = vpop.f32.mrb[2].mxu0  ;;  %v397_v30 = vpop.f32.mrb[2].mxu1 }
 0x130   :  { %v446_v31 = vmul.f32 0.044715, %v331_v23  ;;  %v448_v32 = vmul.f32 0.044715, %v394_v24  ;;  %v335_v33 = vadd.f32 %v334_v29, %v1539_v17  ;;  %v398_v34 = vadd.f32 %v397_v30, %v1541_v18  ;;  %v336_v35 = vpop.f32.mrb[3].mxu0  ;;  %v399_v36 = vpop.f32.mrb[3].mxu1 }
 0x131   :  { %v447_v39 = vmul.f32 0.044715, %v1550_v27  ;;  %v1559_v40 = vadd.f32 %v336_v35, %v1543_v19  ;;  %v449_v41 = vmul.f32 0.044715, %v1553_v28  ;;  %v1563_v47 = vadd.f32 %v399_v36, %v1545_v20 }
 0x132   :  { %v470_v37 = vmul.f32 %v446_v31, %v331_v23  ;;  %v472_v38 = vmul.f32 %v448_v32, %v394_v24  ;;  %v450_v42 = vmul.f32 0.044715, %v335_v33  ;;  %v452_v45 = vmul.f32 0.044715, %v398_v34 }
 0x133   :  { %v471_v51 = vmul.f32 %v447_v39, %v1550_v27  ;;  %v451_v53 = vmul.f32 0.044715, %v1559_v40  ;;  %v473_v57 = vmul.f32 %v449_v41, %v1553_v28  ;;  %v1571_v62 = vmul.f32 0.5, %v331_v23 }
 0x134   :  { %v494_v43 = vmul.f32 %v470_v37, %v331_v23  ;;  %v496_v44 = vmul.f32 %v472_v38, %v394_v24  ;;  %v474_v46 = vmul.f32 %v450_v42, %v335_v33  ;;  %v476_v52 = vmul.f32 %v452_v45, %v398_v34 }
 0x135   :  { %v340_v48 = vpop.f32.mrb[4].mxu0  ;;  %v403_v49 = vpop.f32.mrb[4].mxu1  ;;  %v1573_v63 = vmul.f32 0.5, %v394_v24  ;;  %v1578_v4 = vmul.f32 0.5, %v335_v33  ;;  %v1580_v6 = vmul.f32 0.5, %v398_v34  ;;  %v475_v10 = vmul.f32 %v451_v53, %v1559_v40 }
 0x136   :  { %v518_v50 = vadd.f32 %v494_v43, %v331_v23  ;;  %v342_v54 = vpop.f32.mrb[5].mxu0  ;;  %v405_v55 = vpop.f32.mrb[5].mxu1  ;;  %v520_v56 = vadd.f32 %v496_v44, %v394_v24  ;;  %v498_v58 = vmul.f32 %v474_v46, %v335_v33  ;;  %v1569_v59 = vadd.f32 %v340_v48, %v1539_v17 }
 0x137   :  { %v344_v60 = vpop.f32.mrb[6].mxu0  ;;  %v407_v61 = vpop.f32.mrb[6].mxu1  ;;  %v500_v0 = vmul.f32 %v476_v52, %v398_v34  ;;  %v1576_v1 = vadd.f32 %v403_v49, %v1541_v18  ;;  %v453_v7 = vmul.f32 0.044715, %v1563_v47  ;;  %v1585_v11 = vadd.f32 %v342_v54, %v1543_v19 }
 0x138   :  { %v346_v2 = vpop.f32.mrb[7].mxu0  ;;  %v409_v3 = vpop.f32.mrb[7].mxu1  ;;  %v522_v5 = vadd.f32 %v498_v58, %v335_v33  ;;  %v542_v8 = vmul.f32 0.7978846, %v518_v50  ;;  %v544_v12 = vmul.f32 0.7978846, %v520_v56  ;;  %v1588_v13 = vmul.f32 %v471_v51, %v1550_v27 }
 0x139   :  { %v524_v9 = vadd.f32 %v500_v0, %v398_v34  ;;  %v1591_v14 = vmul.f32 %v473_v57, %v1553_v28  ;;  %v454_v15 = vmul.f32 0.044715, %v1569_v59  ;;  %v456_v21 = vmul.f32 0.044715, %v1576_v1 }
 0x13a   :  { %v546_v16 = vmul.f32 0.7978846, %v522_v5  ;;  %v1596_v22 = vadd.f32 %v405_v55, %v1545_v20  ;;  %v1599_v23 = vadd.f32 %v344_v60, %v1539_v17  ;;  %v477_v25 = vmul.f32 %v453_v7, %v1563_v47 }
 0x13b   :  { %v548_v24 = vmul.f32 0.7978846, %v524_v9  ;;  %v455_v26 = vmul.f32 0.044715, %v1585_v11  ;;  %v1604_v29 = vadd.f32 %v407_v61, %v1541_v18  ;;  %1308 = vtanh.f32 %v542_v8 }
 0x13c   :  { %v499_v32 = vmul.f32 %v475_v10, %v1559_v40  ;;  %v457_v33 = vmul.f32 0.044715, %v1596_v22  ;;  %v458_v34 = vmul.f32 0.044715, %v1599_v23  ;;  %v1611_v38 = vadd.f32 %v346_v2, %v1543_v19 }
 0x13d   :  { %v350_v30 = vpop.f32.mrb[8].mxu0  ;;  %v413_v31 = vpop.f32.mrb[8].mxu1  ;;  %v460_v37 = vmul.f32 0.044715, %v1604_v29  ;;  %v1614_v39 = vadd.f32 %v409_v3, %v1545_v20  ;;  %1310 = vtanh.f32 %v544_v12  ;;  %v478_v44 = vmul.f32 %v454_v15, %v1569_v59 }
 0x13e   :  { %v352_v35 = vpop.f32.mrb[9].mxu0  ;;  %v415_v36 = vpop.f32.mrb[9].mxu1  ;;  %v1617_v41 = vadd.f32 %v350_v30, %v1539_v17  ;;  %v480_v45 = vmul.f32 %v456_v21, %v1576_v1  ;;  %v1622_v46 = vadd.f32 %v413_v31, %v1541_v18  ;;  %1312 = vtanh.f32 %v546_v16 }
 0x13f   :  { %v354_v42 = vpop.f32.mrb[10].mxu0  ;;  %v417_v43 = vpop.f32.mrb[10].mxu1  ;;  %v459_v50 = vmul.f32 0.044715, %v1611_v38  ;;  %v461_v51 = vmul.f32 0.044715, %v1614_v39  ;;  %1314 = vtanh.f32 %v548_v24  ;;  %v479_v53 = vmul.f32 %v455_v26, %v1585_v11 }
 0x140   :  { %v356_v48 = vpop.f32.mrb[11].mxu0  ;;  %v419_v49 = vpop.f32.mrb[11].mxu1  ;;  %v462_v52 = vmul.f32 0.044715, %v1617_v41  ;;  %v464_v54 = vmul.f32 0.044715, %v1622_v46  ;;  %v1630_v55 = vadd.f32 %v352_v35, %v1543_v19  ;;  %v481_v56 = vmul.f32 %v457_v33, %v1596_v22 }
 0x141   :  { %v482_v57 = vmul.f32 %v458_v34, %v1599_v23  ;;  %v484_v58 = vmul.f32 %v460_v37, %v1604_v29  ;;  %v483_v60 = vmul.f32 %v459_v50, %v1611_v38  ;;  %v485_v61 = vmul.f32 %v461_v51, %v1614_v39 }
 0x142   :  { %v463_v0 = vmul.f32 0.044715, %v1630_v55  ;;  %v1639_v2 = vadd.f32 %v415_v36, %v1545_v20  ;;  %v1642_v3 = vadd.f32 %v354_v42, %v1539_v17  ;;  %v501_v5 = vmul.f32 %v477_v25, %v1563_v47 }
 0x143   :  { %v1646_v7 = vmul.f32 %v478_v44, %v1569_v59  ;;  %v486_v8 = vmul.f32 %v462_v52, %v1617_v41  ;;  %v1650_v9 = vadd.f32 %v417_v43, %v1541_v18  ;;  %v1653_v10 = vmul.f32 %v480_v45, %v1576_v1 }
 0x144   :  { %v503_v12 = vmul.f32 %v479_v53, %v1585_v11  ;;  %v488_v15 = vmul.f32 %v464_v54, %v1622_v46  ;;  %v487_v17 = vmul.f32 %v463_v0, %v1630_v55  ;;  %v505_v16 = vmul.f32 %v481_v56, %v1596_v22 }
 0x145   :  { %v506_v21 = vmul.f32 %v482_v57, %v1599_v23  ;;  %v465_v24 = vmul.f32 0.044715, %v1639_v2  ;;  %v466_v25 = vmul.f32 0.044715, %v1642_v3  ;;  %v1309_v26 = vpop.eup %1308  ;;  %v1663_v18 = vmul.f32 %v484_v58, %v1604_v29 }
 0x146   :  { %v507_v30 = vmul.f32 %v483_v60, %v1611_v38  ;;  %v509_v31 = vmul.f32 %v485_v61, %v1614_v39  ;;  %v468_v33 = vmul.f32 0.044715, %v1650_v9  ;;  %v1669_v34 = vmul.f32 %v486_v8, %v1617_v41 }
 0x147   :  { %v1672_v35 = vadd.f32 %v356_v48, %v1543_v19  ;;  %v1675_v36 = vadd.f32 %v419_v49, %v1545_v20  ;;  %v519_v37 = vadd.f32 %v1588_v13, %v1550_v27  ;;  %v1311_v42 = vpop.eup %1310  ;;  %v1680_v43 = vmul.f32 %v488_v15, %v1622_v46 }
 0x148   :  { %v1683_v44 = vmul.f32 %v487_v17, %v1630_v55  ;;  %v1686_v45 = vmul.f32 0.5, %v1550_v27  ;;  %v523_v50 = vadd.f32 %v499_v32, %v1559_v40  ;;  %v1313_v19 = vpop.eup %1312  ;;  %v489_v48 = vmul.f32 %v465_v24, %v1639_v2 }
 0x149   :  { %v490_v20 = vmul.f32 %v466_v25, %v1642_v3  ;;  %v1692_v49 = vmul.f32 0.5, %v1559_v40  ;;  %v543_v13 = vmul.f32 0.7978846, %v519_v37  ;;  %v1315_v51 = vpop.eup %1314  ;;  %v492_v52 = vmul.f32 %v468_v33, %v1650_v9 }
 0x14a   :  { %v547_v53 = vmul.f32 0.7978846, %v523_v50  ;;  %v521_v54 = vadd.f32 %v1591_v14, %v1553_v28  ;;  %v525_v27 = vadd.f32 %v501_v5, %v1563_v47  ;;  %v467_v32 = vmul.f32 0.044715, %v1672_v35 }
 0x14b   :  { %v469_v56 = vmul.f32 0.044715, %v1675_v36  ;;  %1316 = vtanh.f32 %v543_v13  ;;  %v590_v57 = vadd.f32 1.0, %v1309_v26  ;;  %v594_v60 = vadd.f32 1.0, %v1313_v19 }
 0x14c   :  { %1318 = vtanh.f32 %v547_v53  ;;  %v545_v58 = vmul.f32 0.7978846, %v521_v54  ;;  %v549_v40 = vmul.f32 0.7978846, %v525_v27  ;;  %v1701_v61 = vmul.f32 %v489_v48, %v1639_v2 }
 0x14d   :  { %v1704_v0 = vmul.f32 %v490_v20, %v1642_v3  ;;  %v592_v8 = vadd.f32 1.0, %v1311_v42  ;;  %v596_v14 = vadd.f32 1.0, %v1315_v51  ;;  %v1707_v5 = vmul.f32 %v590_v57, %v1571_v62 }
 0x14e   :  { %1320 = vtanh.f32 %v545_v58  ;;  %v1710_v15 = vmul.f32 %v594_v60, %v1578_v4  ;;  %v527_v17 = vadd.f32 %v503_v12, %v1585_v11  ;;  %v531_v26 = vadd.f32 %v507_v30, %v1611_v38 }
 0x14f   :  { %1322 = vtanh.f32 %v549_v40  ;;  %v1714_v24 = vmul.f32 %v592_v8, %v1573_v63  ;;  %v1717_v25 = vmul.f32 %v596_v14, %v1580_v6  ;;  %v491_v33 = vmul.f32 %v467_v32, %v1672_v35 }
 0x150   :  { %v493_v37 = vmul.f32 %v469_v56, %v1675_v36  ;;  %v644_v62 = vpack.c.bf16 %v1710_v15, %v1707_v5  ;;  %v551_v4 = vmul.f32 0.7978846, %v527_v17  ;;  %v555_v42 = vmul.f32 0.7978846, %v531_v26 }
 0x151   :  { %v646_v12 = vpack.c.bf16 %v1717_v25, %v1714_v24  ;;  %v529_v63 = vadd.f32 %v505_v16, %v1596_v22  ;;  %v533_v50 = vadd.f32 %v509_v31, %v1614_v39  ;;  %v1729_v6 = vmul.f32 %v492_v52, %v1650_v9 }
 0x152   :  { %v425_v30 = vmul.f32 0.5, %v1553_v28  ;;  %1324 = vtanh.f32 %v551_v4  ;;  %v526_v19 = vadd.f32 %v1646_v7, %v1569_v59  ;;  %v530_v13 = vadd.f32 %v506_v21, %v1599_v23 }
 0x153   :  { %1326 = vtanh.f32 %v555_v42  ;;  %v553_v48 = vmul.f32 0.7978846, %v529_v63  ;;  %v557_v20 = vmul.f32 0.7978846, %v533_v50  ;;  %v515_v51 = vmul.f32 %v491_v33, %v1672_v35 }
 0x154   :  { %v429_v16 = vmul.f32 0.5, %v1563_v47  ;;  %v550_v53 = vmul.f32 0.7978846, %v526_v19  ;;  %v528_v31 = vadd.f32 %v1653_v10, %v1576_v1  ;;  %v517_v28 = vmul.f32 %v493_v37, %v1675_v36 }
 0x155   :  { %v1317_v52 = vpop.eup %1316  ;;  %1328 = vtanh.f32 %v553_v48  ;;  %v554_v54 = vmul.f32 0.7978846, %v530_v13  ;;  %v532_v7 = vadd.f32 %v1663_v18, %v1604_v29  ;;  %v431_v21 = vmul.f32 0.5, %v1585_v11 }
 0x156   :  { %v1319_v27 = vpop.eup %1318  ;;  %v591_v32 = vadd.f32 1.0, %v1317_v52  ;;  %1330 = vtanh.f32 %v557_v20  ;;  %v552_v56 = vmul.f32 0.7978846, %v528_v31  ;;  %v535_v10 = vadd.f32 %v1683_v44, %v1630_v55 }
 0x157   :  { %v595_v57 = vadd.f32 1.0, %v1319_v27  ;;  %1332 = vtanh.f32 %v550_v53  ;;  %v556_v47 = vmul.f32 0.7978846, %v532_v7  ;;  %v435_v60 = vmul.f32 0.5, %v1611_v38 }
 0x158   :  { %v1321_v58 = vpop.eup %1320  ;;  %v615_v40 = vmul.f32 %v591_v32, %v1686_v45  ;;  %1334 = vtanh.f32 %v554_v54  ;;  %v539_v18 = vadd.f32 %v515_v51, %v1672_v35  ;;  %v559_v5 = vmul.f32 0.7978846, %v535_v10 }
 0x159   :  { %v1323_v8 = vpop.eup %1322  ;;  %v619_v14 = vmul.f32 %v595_v57, %v1692_v49  ;;  %v593_v11 = vadd.f32 1.0, %v1321_v58  ;;  %1336 = vtanh.f32 %v552_v56  ;;  %v433_v17 = vmul.f32 0.5, %v1596_v22 }
 0x15a   :  { %v597_v15 = vadd.f32 1.0, %v1323_v8  ;;  %1338 = vtanh.f32 %v556_v47  ;;  %v563_v26 = vmul.f32 0.7978846, %v539_v18  ;;  %v437_v33 = vmul.f32 0.5, %v1614_v39 }
 0x15b   :  { %v645_v44 = vpack.c.bf16 %v619_v14, %v615_v40  ;;  %1340 = vtanh.f32 %v559_v5  ;;  %v537_v38 = vadd.f32 %v1701_v61, %v1639_v2  ;;  %v617_v37 = vmul.f32 %v593_v11, %v425_v30 }
 0x15c   :  { %v1325_v45 = vpop.eup %1324  ;;  %v621_v4 = vmul.f32 %v597_v15, %v429_v16  ;;  %1342 = vtanh.f32 %v563_v26  ;;  %v541_v49 = vadd.f32 %v517_v28, %v1675_v36  ;;  %v430_v22 = vmul.f32 0.5, %v1569_v59 }
 0x15d   :  { %v1327_v42 = vpop.eup %1326  ;;  %944 = vmatprep.mubr.bf16.mxu0 %v645_v44  ;;  %v599_v63 = vadd.f32 1.0, %v1325_v45  ;;  %v561_v50 = vmul.f32 0.7978846, %v537_v38  ;;  %v534_v19 = vadd.f32 %v1669_v34, %v1617_v41  ;;  %v538_v61 = vadd.f32 %v1704_v0, %v1642_v3 }
 0x15e   :  { %v647_v39 = vpack.c.bf16 %v621_v4, %v617_v37  ;;  %945 = vmatmul.mubr.bf16.vlgmr.msra.gmra.mrb[12].mxu0 %v644_v62  ;;  %v603_v48 = vadd.f32 1.0, %v1327_v42  ;;  %v565_v20 = vmul.f32 0.7978846, %v541_v49  ;;  %v434_v51 = vmul.f32 0.5, %v1599_v23 }
 0x15f   :  { %v1329_v30 = vpop.eup %1328  ;;  %v623_v13 = vmul.f32 %v599_v63, %v431_v21  ;;  %1344 = vtanh.f32 %v561_v50  ;;  %v558_v16 = vmul.f32 0.7978846, %v534_v19  ;;  %v562_v52 = vmul.f32 0.7978846, %v538_v61 }
 0x160   :  { %v1331_v53 = vpop.eup %1330  ;;  %1001 = vmatprep.mubr.bf16.mxu1 %v647_v39  ;;  %v627_v59 = vmul.f32 %v603_v48, %v435_v60  ;;  %v601_v31 = vadd.f32 1.0, %v1329_v30  ;;  %1346 = vtanh.f32 %v565_v20  ;;  %v432_v0 = vmul.f32 0.5, %v1576_v1 }
 0x161   :  { %v1333_v34 = vpop.eup %1332  ;;  %1002 = vmatmul.mubr.bf16.vlgmr.msra.gmra.mrb[12].mxu1 %v646_v12  ;;  %v605_v62 = vadd.f32 1.0, %v1331_v53  ;;  %1348 = vtanh.f32 %v558_v16  ;;  %v536_v23 = vadd.f32 %v1680_v43, %v1622_v46  ;;  %v540_v57 = vadd.f32 %v1729_v6, %v1650_v9 }
 0x162   :  { %v1335_v28 = vpop.eup %1334  ;;  %v649_v54 = vpack.c.bf16 %v627_v59, %v623_v13  ;;  %v625_v7 = vmul.f32 %v601_v31, %v433_v17  ;;  %v598_v27 = vadd.f32 1.0, %v1333_v34  ;;  %1350 = vtanh.f32 %v562_v52 }
 0x163   :  { %v1337_v32 = vpop.eup %1336  ;;  %v629_v21 = vmul.f32 %v605_v62, %v437_v33  ;;  %v602_v56 = vadd.f32 1.0, %v1335_v28  ;;  %v560_v24 = vmul.f32 0.7978846, %v536_v23  ;;  %v436_v1 = vmul.f32 0.5, %v1604_v29 }
 0x164   :  { %v1339_v25 = vpop.eup %1338  ;;  %952 = vmatprep.mubr.bf16.mxu0 %v649_v54  ;;  %v622_v12 = vmul.f32 %v598_v27, %v430_v22  ;;  %v600_v47 = vadd.f32 1.0, %v1337_v32  ;;  %v439_v43 = vmul.f32 0.5, %v1630_v55  ;;  %v564_v18 = vmul.f32 0.7978846, %v540_v57 }
 0x165   :  { %v1341_v10 = vpop.eup %1340  ;;  %v651_v58 = vpack.c.bf16 %v629_v21, %v625_v7  ;;  %v626_v40 = vmul.f32 %v602_v56, %v434_v51  ;;  %v604_v60 = vadd.f32 1.0, %v1339_v25  ;;  %v443_v11 = vmul.f32 0.5, %v1672_v35 }
 0x166   :  { %v1343_v8 = vpop.eup %1342  ;;  %v624_v14 = vmul.f32 %v600_v47, %v432_v0  ;;  %v607_v5 = vadd.f32 1.0, %v1341_v10  ;;  %1352 = vtanh.f32 %v560_v24  ;;  %v441_v4 = vmul.f32 0.5, %v1639_v2 }
 0x167   :  { %1009 = vmatprep.mubr.bf16.mxu1 %v651_v58  ;;  %v648_v6 = vpack.c.bf16 %v626_v40, %v622_v12  ;;  %v628_v15 = vmul.f32 %v604_v60, %v436_v1  ;;  %v611_v17 = vadd.f32 1.0, %v1343_v8  ;;  %1354 = vtanh.f32 %v564_v18 }
 0x168   :  { %v631_v55 = vmul.f32 %v607_v5, %v439_v43  ;;  %v445_v35 = vmul.f32 0.5, %v1675_v36  ;;  %v438_v63 = vmul.f32 0.5, %v1617_v41  ;;  %v442_v39 = vmul.f32 0.5, %v1642_v3 }
 0x169   :  { %v1345_v29 = vpop.eup %1344  ;;  %953 = vmatmul.mubr.bf16.gmra.mrb[16].mxu0 %v648_v6  ;;  %v650_v26 = vpack.c.bf16 %v628_v15, %v624_v14  ;;  %v635_v44 = vmul.f32 %v611_v17, %v443_v11  ;;  %v440_v36 = vmul.f32 0.5, %v1622_v46  ;;  %v444_v53 = vmul.f32 0.5, %v1650_v9  ;;  %v1148_v46 = vld [vmem:[%s1799_s4] ss:$0 sm:$0xff]  ;;  %s1460_s4 = smov [#allocation9]  }
 0x16a   :  { %v1347_v33 = vpop.eup %1346  ;;  %v609_v38 = vadd.f32 1.0, %v1345_v29  ;;  %s1071_s10 = sshll.u32 %s1460_s4, 4  ;;  %s1072_s10 = int_to_ptr.vmem [resolvable:$true] %s1071_s10 }
 0x16b   :  { %v1349_v45 = vpop.eup %1348  ;;  %1010 = vmatmul.mubr.bf16.gmra.mrb[16].mxu1 %v650_v26  ;;  %v653_v37 = vpack.c.bf16 %v635_v44, %v631_v55  ;;  %v613_v49 = vadd.f32 1.0, %v1347_v33  ;;  %s1422_s11 = scalar_lea.vmem %s1072_s10, 768  ;;  %p1427_p11 = scmp.lt.s32.totalorder %s1072_s10, %s1072_s10 }
 0x16c   :  { %v1351_v42 = vpop.eup %1350  ;;  %v606_v22 = vadd.f32 1.0, %v1349_v45  ;;  %v633_v50 = vmul.f32 %v609_v38, %v441_v4  ;;  %p1423_p10 = scmp.ne.s32.totalorder %s1072_s10, %s1422_s11  ;;  %p1428_p12 = scmp.lt.s32.totalorder %s1422_s11, %s1422_s11 }
 0x16d   :  { %960 = vmatprep.mubr.bf16.mxu0 %v653_v37  ;;  %v637_v19 = vmul.f32 %v613_v49, %v445_v35  ;;  %v610_v48 = vadd.f32 1.0, %v1351_v42 }
 0x16e   :  { %v630_v61 = vmul.f32 %v606_v22, %v438_v63  ;;  %p1429_p13 = por %p1428_p12, %p1427_p11 }
 0x16f   :  { %v655_v20 = vpack.c.bf16 %v637_v19, %v633_v50  ;;  %v634_v30 = vmul.f32 %v610_v48, %v442_v39 }
 0x170   :  { %v1353_v13 = vpop.eup %1352  ;;  %p1430_p0 = pnand %p1429_p13, %p1423_p10 }
 0x171   :  { %v1355_v51 = vpop.eup %1354  ;;  %1017 = vmatprep.mubr.bf16.mxu1 %v655_v20  ;;  %v652_v2 = vpack.c.bf16 %v634_v30, %v630_v61  ;;  %v608_v16 = vadd.f32 1.0, %v1353_v13 }
 0x172   :  { %v612_v41 = vadd.f32 1.0, %v1355_v51 }
 0x173   :  { %961 = vmatmul.mubr.bf16.gmra.mrb[20].mxu0 %v652_v2  ;;  %v632_v59 = vmul.f32 %v608_v16, %v440_v36 }
 0x174   :  { %v636_v31 = vmul.f32 %v612_v41, %v444_v53 }
 0x176   :  { %v654_v52 = vpack.c.bf16 %v636_v31, %v632_v59 }
 0x178   :  { %1018 = vmatmul.mubr.bf16.gmra.mrb[20].mxu1 %v654_v52 }
 0x231   :  { %v1165_v3 = vpop.f32.mrb[12].mxu0 }
 0x232   :  { %v1166_v34 = vpop.f32.mrb[13].mxu0 }
 0x233   :  { %v1167_v62 = vadd.f32 %v1166_v34, %v1165_v3  ;;  %v1168_v0 = vpop.f32.mrb[14].mxu0 }
 0x234   :  { %v1199_v23 = vpop.f32.mrb[12].mxu1  ;;  %v1169_v28 = vpop.f32.mrb[15].mxu0 }
 0x235   :  { %v1200_v54 = vpop.f32.mrb[13].mxu1  ;;  %v1170_v7 = vadd.f32 %v1169_v28, %v1168_v0 }
 0x236   :  { %v1201_v27 = vadd.f32 %v1200_v54, %v1199_v23  ;;  %v1202_v32 = vpop.f32.mrb[14].mxu1 }
 0x237   :  { %v1203_v9 = vpop.f32.mrb[15].mxu1 }
 0x238   :  { %v1004_v21 = vadd.f32 %v1201_v27, %v1167_v62  ;;  %v1204_v56 = vadd.f32 %v1203_v9, %v1202_v32 }
 0x23a   :  { %v1054_v57 = vadd.f32 %v1148_v46, %v1004_v21  ;;  %v1007_v24 = vadd.f32 %v1204_v56, %v1170_v7 }
 0x23c   :  { %1060 = vst [vmem:[#allocation9] sm:$0xff] %v1054_v57  ;;  %v1055_v25 = vadd.f32 %v1148_v46, %v1007_v24  ;;  %v1171_v12 = vpop.f32.mrb[16].mxu0 }
 0x23d   :  { %v1172_v1 = vpop.f32.mrb[17].mxu0 }
 0x23e   :  { %1061 = vst [vmem:[#allocation9 + $0x8] sm:$0xff] %v1055_v25  ;;  %v1205_v47 = vpop.f32.mrb[16].mxu1  ;;  %v1173_v43 = vadd.f32 %v1172_v1, %v1171_v12  ;;  %v1174_v10 = vpop.f32.mrb[18].mxu0 }
 0x23f   :  { %v1206_v58 = vpop.f32.mrb[17].mxu1  ;;  %v1175_v40 = vpop.f32.mrb[19].mxu0 }
 0x240   :  { %v1207_v60 = vadd.f32 %v1206_v58, %v1205_v47  ;;  %v1208_v18 = vpop.f32.mrb[18].mxu1  ;;  %v1176_v8 = vadd.f32 %v1175_v40, %v1174_v10 }
 0x241   :  { %v1209_v14 = vpop.f32.mrb[19].mxu1 }
 0x242   :  { %v1012_v11 = vadd.f32 %v1207_v60, %v1173_v43  ;;  %v1210_v5 = vadd.f32 %v1209_v14, %v1208_v18 }
 0x244   :  { %v1056_v6 = vadd.f32 %v1148_v46, %v1012_v11  ;;  %v1015_v15 = vadd.f32 %v1210_v5, %v1176_v8 }
 0x246   :  { %1062 = vst [vmem:[#allocation9 + $0x10] sm:$0xff] %v1056_v6  ;;  %v1057_v17 = vadd.f32 %v1148_v46, %v1015_v15  ;;  %v1177_v29 = vpop.f32.mrb[20].mxu0 }
 0x247   :  { %v1178_v26 = vpop.f32.mrb[21].mxu0 }
 0x248   :  { %1063 = vst [vmem:[#allocation9 + $0x18] sm:$0xff] %v1057_v17  ;;  %v1179_v55 = vadd.f32 %v1178_v26, %v1177_v29  ;;  %v1180_v44 = vpop.f32.mrb[22].mxu0 }
 0x249   :  { %v1181_v33 = vpop.f32.mrb[23].mxu0 }
 0x24a   :  { %v1182_v38 = vadd.f32 %v1181_v33, %v1180_v44 }
 0x24b   :  { %v1211_v45 = vpop.f32.mrb[20].mxu1 }
 0x24c   :  { %v1212_v37 = vpop.f32.mrb[21].mxu1 }
 0x24d   :  { %v1213_v4 = vadd.f32 %v1212_v37, %v1211_v45  ;;  %v1214_v35 = vpop.f32.mrb[22].mxu1 }
 0x24e   :  { %v1215_v49 = vpop.f32.mrb[23].mxu1 }
 0x24f   :  { %v1020_v42 = vadd.f32 %v1213_v4, %v1179_v55  ;;  %v1216_v63 = vadd.f32 %v1215_v49, %v1214_v35 }
 0x251   :  { %v1058_v22 = vadd.f32 %v1148_v46, %v1020_v42  ;;  %v1023_v50 = vadd.f32 %v1216_v63, %v1182_v38 }
 0x253   :  { %1064 = vst [vmem:[#allocation9 + $0x20] sm:$0xff] %v1058_v22  ;;  %v1059_v19 = vadd.f32 %v1148_v46, %v1023_v50 }
 0x255   :  { %1065 = vst [vmem:[#allocation9 + $0x28] sm:$0xff] %v1059_v19 }
 0x256   :  { %1433 = shalt.err (!%p1430_p0)
}
 0x257   :  { %s1434_s14 = scalar_lea.hbm %s1800_s5, 768 }
 0x258   :  { %p1435_p1 = scmp.ne.s32.totalorder %s1800_s5, %s1434_s14  ;;  %p1438_p2 = scmp.lt.u32.totalorder %s1434_s14, %s1800_s5 }
 0x25a   :  { %p1440_p3 = pnand %p1438_p2, %p1435_p1 }
 0x25c   :  { %1443 = shalt.err (!%p1440_p3)
}
 0x25d   :  { %1077 = dma.vmem_to_hbm [thread:$0]  %s1072_s10, 768, %s1800_s5, [#allocation5], %s1454_s1, %s1454_s1, %s1455_s17  }
 0x25e   :  { %1448 = dma.done.wait [#allocation5], 768  }
 0x25f   :  { %1449 = vsyncadd [#allocation5], 4294966528 }
 0x260   :  { %1081 = vsyncpa [#allocation4], 1 }
 0x261   :  { %1082 = vsyncpa [#allocation7], 1 }
 0x262   :  { %1083 = vsyncpa [#allocation5], 1 }

</bundles_post_ra>
